<compile_context>
chip_gen: v6e
topology: v6e:2x2x1
jax: 0.10.0
libtpu: 0.0.40
codegen_flags: <defaults>
</compile_context>

<pallas_src>
import functools
import math

import jax
import jax.numpy as jnp
from jax import lax
from jax.experimental import pallas as pl
from jax.experimental.pallas import tpu as pltpu

_EPS = 1e-5


# -----------------------------------------------------------------------------
# Kernels.  Layout: one image per grid step, activations as (H, W*C) with
# (width, channel) interleaved on the lane axis (lane = w*C + c).
# -----------------------------------------------------------------------------
def _conv1_skip_kernel(x_ref, w1b_ref, y1_ref, skip_ref, s1_ref, *, wc):
    """conv1 (+ folded 1x1/identity skip) via banded matmuls + BN1 partial stats."""
    x = x_ref[0]                                              # (H, W*Cin)
    zrow = jnp.zeros((1, x.shape[1]), x.dtype)
    x_dn = jnp.concatenate([zrow, x[:-1, :]], axis=0)         # row r -> x[r-1] (top zero pad)
    x_up = jnp.concatenate([x[1:, :], zrow], axis=0)          # row r -> x[r+1] (bottom zero pad)
    # Three banded matmuls (ky = 0, 1, 2); kx taps + width padding are encoded
    # in the weight band; the ky=1 band also carries the skip-path columns.
    acc = (jnp.dot(x_dn, w1b_ref[0], preferred_element_type=jnp.float32)
           + jnp.dot(x, w1b_ref[1], preferred_element_type=jnp.float32)
           + jnp.dot(x_up, w1b_ref[2], preferred_element_type=jnp.float32))
    conv = acc[:, :wc]                                        # conv1 pre-BN, lane-dense
    y1_ref[0] = conv
    skip_ref[0] = acc[:, wc:]                                 # skip path (1x1 conv / identity)
    s1_ref[0] = jnp.concatenate(
        [jnp.sum(conv, axis=0, keepdims=True),
         jnp.sum(conv * conv, axis=0, keepdims=True)], axis=0)


def _bn1_conv2_kernel(y1_ref, bn1_ref, w2b_ref, y2_ref, s2_ref, *, compute_dtype):
    """Fused BN1-apply + ReLU, banded conv2, BN2 partial stats."""
    bn = bn1_ref[...]                                         # (2, W*Cout): [scale; bias]
    h1 = jnp.maximum(y1_ref[0] * bn[0:1, :] + bn[1:2, :], 0.0).astype(compute_dtype)
    zrow = jnp.zeros((1, h1.shape[1]), compute_dtype)
    h_dn = jnp.concatenate([zrow, h1[:-1, :]], axis=0)
    h_up = jnp.concatenate([h1[1:, :], zrow], axis=0)
    acc = (jnp.dot(h_dn, w2b_ref[0], preferred_element_type=jnp.float32)
           + jnp.dot(h1, w2b_ref[1], preferred_element_type=jnp.float32)
           + jnp.dot(h_up, w2b_ref[2], preferred_element_type=jnp.float32))
    y2_ref[0] = acc
    s2_ref[0] = jnp.concatenate(
        [jnp.sum(acc, axis=0, keepdims=True),
         jnp.sum(acc * acc, axis=0, keepdims=True)], axis=0)


def _bn2_add_relu_kernel(y2_ref, skip_ref, bn2_ref, o_ref):
    """BN2-apply + residual add + ReLU (lane-dense elementwise)."""
    bn = bn2_ref[...]
    o_ref[0] = jnp.maximum(y2_ref[0] * bn[0:1, :] + bn[1:2, :] + skip_ref[0], 0.0)


# -----------------------------------------------------------------------------
# Host-side (trace-time) helpers: banded weights, BN folding, VMEM sizing.
# -----------------------------------------------------------------------------
def _banded_conv_weights(w_taps, c_in, c_out, width):
    """(9, Cin, Cout) tap-major 3x3 weights -> (3, W*Cin, W*Cout) banded matrices.

    B[ky][(w+kx-1)*Cin + ci, w*Cout + co] = w_taps[ky*3 + kx, ci, co]; width
    zero-padding is realized by omitting out-of-range bands.
    """
    kx = jnp.arange(3)[:, None, None]
    p = jnp.arange(width)[None, :, None]
    wcol = jnp.arange(width)[None, None, :]
    sel = (p == wcol + kx - 1).astype(jnp.float32)            # (3, W, W)
    wr = w_taps.reshape(3, 3, c_in, c_out).astype(jnp.float32)
    band = jnp.einsum("xpw,yxic->ypiwc", sel, wr)             # (3, W, Cin, W, Cout)
    return band.reshape(3, width * c_in, width * c_out)


def _skip_band(wskip, c_in, c_out, width):
    """(Cin, Cout) 1x1 weights -> (W*Cin, W*Cout) block-diagonal matrix."""
    band = jnp.einsum("pw,ic->piwc", jnp.eye(width, dtype=jnp.float32),
                      wskip.astype(jnp.float32))
    return band.reshape(width * c_in, width * c_out)


def _fold_bn(stats, gamma, beta, width, c_out, n_valid):
    """Fold batch stats + affine params into per-lane (scale, bias) rows."""
    s = jnp.sum(stats, axis=0).reshape(2, width, c_out).sum(axis=1)   # (2, Cout)
    mean = s[0] / n_valid
    # TODO(synk): single-pass E[x^2]-E[x]^2 variance; fine when |mean| ~ std,
    # a shifted two-pass would be safer for extreme per-channel offsets.
    var = jnp.maximum(s[1] / n_valid - mean * mean, 0.0)
    scale = gamma * lax.rsqrt(var + _EPS)
    bias = beta - mean * scale
    return jnp.stack([jnp.tile(scale, width), jnp.tile(bias, width)], axis=0)


def _ceil_to(x, m):
    return -(-x // m) * m


def _padded_bytes(shape, dtype):
    itemsize = jnp.dtype(dtype).itemsize
    sublane = 8 * (4 // itemsize)                 # 8 for f32, 16 for bf16
    rows = shape[-2] if len(shape) >= 2 else 1
    cols = shape[-1]
    lead = math.prod(shape[:-2]) if len(shape) > 2 else 1
    return lead * _ceil_to(rows, sublane) * _ceil_to(cols, 128) * itemsize


def _vmem_limit(blocks):
    """~1.5x the per-tile working set, capped by the chip's physical VMEM."""
    est = sum(nbuf * _padded_bytes(shape, dtype) for shape, dtype, nbuf in blocks)
    cap = 64 * 1024 * 1024                        # conservative (v7x per-core)
    try:
        cap = int(pltpu.get_tpu_info().vmem_capacity_bytes)
    except Exception:
        pass
    return int(min(max(int(1.5 * est), 8 * 1024 * 1024), int(0.9 * cap)))


# -----------------------------------------------------------------------------
# Public wrapper.
# -----------------------------------------------------------------------------
def residual_block_forward(x_nchw, params, *, use_bf16_matmul=False):
    """ResidualBlock forward (stride=1, training-mode BN).

    x_nchw: (N, Cin, H, W) f32 -> (N, Cout, H, W) f32.
    params: (w1, w2, wskip, g1, b1, g2, b2); conv weights tap-major
            (KH*KW, Cin, Cout) (w[t=ky*3+kx, ci, co] == torch W[co, ci, ky, kx]);
            wskip (Cin, Cout) is ignored when Cin == Cout (identity skip).
    use_bf16_matmul: bf16 MXU operands (v6e/v7x), f32 accumulation & BN math.
    """
    w1, w2, wskip, g1, b1, g2, b2 = params
    n, c_in, h, w = x_nchw.shape
    c_out = w1.shape[-1]
    wcin, wc = w * c_in, w * c_out
    n_valid = float(n * h * w)
    cdt = jnp.bfloat16 if use_bf16_matmul else jnp.float32

    # Layout: NCHW -> (N, H, W*Cin), channels fastest on the lane axis.
    x_rows = jnp.transpose(x_nchw, (0, 2, 3, 1)).reshape(n, h, wcin).astype(cdt)

    # Banded (block-Toeplitz) weights; skip path folded into conv1's ky=1 band.
    wskip_eff = wskip if c_in != c_out else jnp.eye(c_in, dtype=jnp.float32)
    w1_band = _banded_conv_weights(w1, c_in, c_out, w)          # (3, W*Cin, W*Cout)
    sk_band = _skip_band(wskip_eff, c_in, c_out, w)             # (W*Cin, W*Cout)
    zeros_sk = jnp.zeros_like(sk_band)
    w1b = jnp.concatenate(
        [w1_band, jnp.stack([zeros_sk, sk_band, zeros_sk])], axis=-1).astype(cdt)
    w2b = _banded_conv_weights(w2, c_out, c_out, w).astype(cdt)  # (3, W*Cout, W*Cout)

    sem = ("parallel",)                       # batch grid: megacore + pipelining
    row_map = lambda i: (i, 0, 0)
    const3 = lambda i: (0, 0, 0)
    const2 = lambda i: (0, 0)

    # ---- pass 1: conv1 (+ folded skip) and BN1 partial stats ----------------
    vlim1 = _vmem_limit([((1, h, wcin), cdt, 2), (w1b.shape, cdt, 1),
                         ((1, h, wc), jnp.float32, 4),
                         ((1, 2, wc), jnp.float32, 2)])
    y1, skip, st1 = pl.pallas_call(
        functools.partial(_conv1_skip_kernel, wc=wc),
        grid=(n,),
        in_specs=[pl.BlockSpec((1, h, wcin), row_map),
                  pl.BlockSpec(w1b.shape, const3)],
        out_specs=(pl.BlockSpec((1, h, wc), row_map),
                   pl.BlockSpec((1, h, wc), row_map),
                   pl.BlockSpec((1, 2, wc), row_map)),
        out_shape=(jax.ShapeDtypeStruct((n, h, wc), jnp.float32),
                   jax.ShapeDtypeStruct((n, h, wc), jnp.float32),
                   jax.ShapeDtypeStruct((n, 2, wc), jnp.float32)),
        compiler_params=pltpu.CompilerParams(
            dimension_semantics=sem, vmem_limit_bytes=vlim1),
    )(x_rows, w1b)

    bn1 = _fold_bn(st1, g1.astype(jnp.float32), b1.astype(jnp.float32),
                   w, c_out, n_valid)                            # (2, W*Cout)

    # ---- pass 2: BN1-apply + ReLU + conv2 and BN2 partial stats -------------
    vlim2 = _vmem_limit([((1, h, wc), jnp.float32, 2), ((2, wc), jnp.float32, 1),
                         (w2b.shape, cdt, 1),
                         ((1, h, wc), jnp.float32, 2),
                         ((1, 2, wc), jnp.float32, 2)])
    y2, st2 = pl.pallas_call(
        functools.partial(_bn1_conv2_kernel, compute_dtype=cdt),
        grid=(n,),
        in_specs=[pl.BlockSpec((1, h, wc), row_map),
                  pl.BlockSpec((2, wc), const2),
                  pl.BlockSpec(w2b.shape, const3)],
        out_specs=(pl.BlockSpec((1, h, wc), row_map),
                   pl.BlockSpec((1, 2, wc), row_map)),
        out_shape=(jax.ShapeDtypeStruct((n, h, wc), jnp.float32),
                   jax.ShapeDtypeStruct((n, 2, wc), jnp.float32)),
        compiler_params=pltpu.CompilerParams(
            dimension_semantics=sem, vmem_limit_bytes=vlim2),
    )(y1, bn1, w2b)

    bn2 = _fold_bn(st2, g2.astype(jnp.float32), b2.astype(jnp.float32),
                   w, c_out, n_valid)

    # ---- pass 3: BN2-apply + residual add + ReLU -----------------------------
    vlim3 = _vmem_limit([((1, h, wc), jnp.float32, 4), ((2, wc), jnp.float32, 1),
                         ((1, h, wc), jnp.float32, 2)])
    out_rows = pl.pallas_call(
        _bn2_add_relu_kernel,
        grid=(n,),
        in_specs=[pl.BlockSpec((1, h, wc), row_map),
                  pl.BlockSpec((1, h, wc), row_map),
                  pl.BlockSpec((2, wc), const2)],
        out_specs=pl.BlockSpec((1, h, wc), row_map),
        out_shape=jax.ShapeDtypeStruct((n, h, wc), jnp.float32),
        compiler_params=pltpu.CompilerParams(
            dimension_semantics=sem, vmem_limit_bytes=vlim3),
    )(y2, skip, bn2)

    # Back to NCHW; outputs are already exactly (N, H, W, Cout) — no crop.
    return jnp.transpose(out_rows.reshape(n, h, w, c_out), (0, 3, 1, 2))


# -----------------------------------------------------------------------------
# Pure-JAX (lax.conv) reference of the PyTorch forward, NCHW.
# -----------------------------------------------------------------------------
def _reference_forward(x, w1, w2, wskip, g1, b1, g2, b2):
    c_in = x.shape[1]
    c_out = w1.shape[-1]

    def bn(z, g, b):
        mean = z.mean(axis=(0, 2, 3), keepdims=True)
        var = ((z - mean) ** 2).mean(axis=(0, 2, 3), keepdims=True)
        return ((z - mean) * lax.rsqrt(var + _EPS)
                * g.reshape(1, -1, 1, 1) + b.reshape(1, -1, 1, 1))

    def conv(z, wt):
        ci, co = wt.shape[1], wt.shape[2]
        w_oihw = jnp.transpose(wt.reshape(3, 3, ci, co), (3, 2, 0, 1))
        return lax.conv_general_dilated(
            z, w_oihw, (1, 1), ((1, 1), (1, 1)),
            dimension_numbers=("NCHW", "OIHW", "NCHW"))

    y = jax.nn.relu(bn(conv(x, w1), g1, b1))
    y = bn(conv(y, w2), g2, b2)
    skip = jnp.einsum("nchw,co->nohw", x, wskip) if c_in != c_out else x
    return jax.nn.relu(y + skip)


if __name__ == "__main__":
    N, C_IN, C_OUT, H, W = 2, 4, 8, 16, 16

    key = jax.random.PRNGKey(0)
    ks = jax.random.split(key, 8)
    x = jax.random.normal(ks[0], (N, C_IN, H, W), jnp.float32)
    # conv weights: (KH*KW, Cin, Cout); w[t=ky*3+kx, ci, co] == torch W[co,ci,ky,kx]
    w1 = jax.random.normal(ks[1], (9, C_IN, C_OUT), jnp.float32) / jnp.sqrt(9.0 * C_IN)
    w2 = jax.random.normal(ks[2], (9, C_OUT, C_OUT), jnp.float32) / jnp.sqrt(9.0 * C_OUT)
    wskip = jax.random.normal(ks[3], (C_IN, C_OUT), jnp.float32) / jnp.sqrt(1.0 * C_IN)
    g1 = 1.0 + 0.1 * jax.random.normal(ks[4], (C_OUT,), jnp.float32)
    b1 = 0.1 * jax.random.normal(ks[5], (C_OUT,), jnp.float32)
    g2 = 1.0 + 0.1 * jax.random.normal(ks[6], (C_OUT,), jnp.float32)
    b2 = 0.1 * jax.random.normal(ks[7], (C_OUT,), jnp.float32)
    params = (w1, w2, wskip, g1, b1, g2, b2)

    ref = _reference_forward(x, *params)

    fwd = jax.jit(residual_block_forward, static_argnames=("use_bf16_matmul",))

    # f32 path: tight tolerance against the f32 reference.
    out = jax.block_until_ready(fwd(x, params))
    assert out.shape == ref.shape == (N, C_OUT, H, W)
    if not jnp.allclose(out, ref, rtol=2e-3, atol=2e-3):
        max_err = float(jnp.max(jnp.abs(out - ref)))
        raise AssertionError(f"f32 kernel/reference mismatch, max abs err = {max_err}")

    # bf16 MXU-operand path (v6e/v7x option): loose tolerance vs f32 reference.
    out_bf16 = jax.block_until_ready(fwd(x, params, use_bf16_matmul=True))
    if not jnp.allclose(out_bf16, ref, rtol=1e-1, atol=1e-1):
        max_err = float(jnp.max(jnp.abs(out_bf16 - ref)))
        raise AssertionError(f"bf16 kernel/reference mismatch, max abs err = {max_err}")

    print("KERNEL_OK")
</pallas_src>

<mosaic_0001>
module attributes {stable_mosaic.version = 11 : i64} {
  func.func @_conv1_skip_kernel(%arg0: i32, %arg1: memref<1x16x64xf32, #tpu.memory_space<vmem>>, %arg2: memref<3x64x256xf32, #tpu.memory_space<vmem>>, %arg3: memref<1x16x128xf32, #tpu.memory_space<vmem>>, %arg4: memref<1x16x128xf32, #tpu.memory_space<vmem>>, %arg5: memref<1x2x128xf32, #tpu.memory_space<vmem>>) attributes {dimension_semantics = [#tpu.dimension_semantics<parallel>], iteration_bounds = array<i64: 2>, scalar_prefetch = 0 : i64, scratch_operands = 0 : i64, tpu.core_type = #tpu.core_type<tc>, window_params = [{transform_indices = @transform_0, window_bounds = array<i64: 1, 16, 64>}, {pipeline_mode = #tpu.pipeline_mode<synchronous>, transform_indices = @transform_1, window_bounds = array<i64: 3, 64, 256>}, {transform_indices = @transform_2, window_bounds = array<i64: 1, 16, 128>}, {transform_indices = @transform_3, window_bounds = array<i64: 1, 16, 128>}, {transform_indices = @transform_4, window_bounds = array<i64: 1, 2, 128>}]} {
    %c0 = arith.constant 0 : index
    %c0_0 = arith.constant 0 : index
    %c0_1 = arith.constant 0 : index
    %0 = vector.load %arg1[%c0, %c0_0, %c0_1] : memref<1x16x64xf32, #tpu.memory_space<vmem>>, vector<1x16x64xf32>
    %1 = vector.shape_cast %0 : vector<1x16x64xf32> to vector<16x64xf32>
    %cst = arith.constant 0.000000e+00 : f32
    %2 = vector.broadcast %cst : f32 to vector<1x64xf32>
    %3 = vector.extract_strided_slice %1 {offsets = [0, 0], sizes = [15, 64], strides = [1, 1]} : vector<16x64xf32> to vector<15x64xf32>
    %4 = tpu.concatenate %2, %3 in 0 : vector<1x64xf32>, vector<15x64xf32> -> vector<16x64xf32>
    %5 = vector.extract_strided_slice %1 {offsets = [1, 0], sizes = [15, 64], strides = [1, 1]} : vector<16x64xf32> to vector<15x64xf32>
    %6 = tpu.concatenate %5, %2 in 0 : vector<15x64xf32>, vector<1x64xf32> -> vector<16x64xf32>
    %c0_2 = arith.constant 0 : index
    %c0_3 = arith.constant 0 : index
    %c0_4 = arith.constant 0 : index
    %7 = vector.load %arg2[%c0_2, %c0_3, %c0_4] : memref<3x64x256xf32, #tpu.memory_space<vmem>>, vector<1x64x256xf32>
    %8 = vector.shape_cast %7 : vector<1x64x256xf32> to vector<64x256xf32>
    %cst_5 = arith.constant dense<0.000000e+00> : vector<16x256xf32>
    %9 = tpu.matmul %4, %8, %cst_5 {dimension_numbers = #tpu.dot_dimension_numbers<[1], [0], [0], [1], [0, 0, 1, 1], [], []>} : vector<16x64xf32>, vector<64x256xf32>, vector<16x256xf32> -> vector<16x256xf32>
    %c1 = arith.constant 1 : index
    %c0_6 = arith.constant 0 : index
    %c0_7 = arith.constant 0 : index
    %10 = vector.load %arg2[%c1, %c0_6, %c0_7] : memref<3x64x256xf32, #tpu.memory_space<vmem>>, vector<1x64x256xf32>
    %11 = vector.shape_cast %10 : vector<1x64x256xf32> to vector<64x256xf32>
    %cst_8 = arith.constant dense<0.000000e+00> : vector<16x256xf32>
    %12 = tpu.matmul %1, %11, %cst_8 {dimension_numbers = #tpu.dot_dimension_numbers<[1], [0], [0], [1], [0, 0, 1, 1], [], []>} : vector<16x64xf32>, vector<64x256xf32>, vector<16x256xf32> -> vector<16x256xf32>
    %13 = arith.addf %9, %12 : vector<16x256xf32>
    %c2 = arith.constant 2 : index
    %c0_9 = arith.constant 0 : index
    %c0_10 = arith.constant 0 : index
    %14 = vector.load %arg2[%c2, %c0_9, %c0_10] : memref<3x64x256xf32, #tpu.memory_space<vmem>>, vector<1x64x256xf32>
    %15 = vector.shape_cast %14 : vector<1x64x256xf32> to vector<64x256xf32>
    %cst_11 = arith.constant dense<0.000000e+00> : vector<16x256xf32>
    %16 = tpu.matmul %6, %15, %cst_11 {dimension_numbers = #tpu.dot_dimension_numbers<[1], [0], [0], [1], [0, 0, 1, 1], [], []>} : vector<16x64xf32>, vector<64x256xf32>, vector<16x256xf32> -> vector<16x256xf32>
    %17 = arith.addf %13, %16 : vector<16x256xf32>
    %18 = vector.extract_strided_slice %17 {offsets = [0, 0], sizes = [16, 128], strides = [1, 1]} : vector<16x256xf32> to vector<16x128xf32>
    %c0_12 = arith.constant 0 : index
    %c0_13 = arith.constant 0 : index
    %c0_14 = arith.constant 0 : index
    %19 = vector.load %arg3[%c0_12, %c0_13, %c0_14] : memref<1x16x128xf32, #tpu.memory_space<vmem>>, vector<1x16x128xf32>
    %20 = vector.shape_cast %19 : vector<1x16x128xf32> to vector<16x128xf32>
    %21 = vector.shape_cast %18 : vector<16x128xf32> to vector<1x16x128xf32>
    tpu.vector_store %arg3[%c0_12, %c0_13, %c0_14], %21 {strides = array<i32>} : memref<1x16x128xf32, #tpu.memory_space<vmem>>, vector<1x16x128xf32>,
    %22 = vector.extract_strided_slice %17 {offsets = [0, 128], sizes = [16, 128], strides = [1, 1]} : vector<16x256xf32> to vector<16x128xf32>
    %c0_15 = arith.constant 0 : index
    %c0_16 = arith.constant 0 : index
    %c0_17 = arith.constant 0 : index
    %23 = vector.load %arg4[%c0_15, %c0_16, %c0_17] : memref<1x16x128xf32, #tpu.memory_space<vmem>>, vector<1x16x128xf32>
    %24 = vector.shape_cast %23 : vector<1x16x128xf32> to vector<16x128xf32>
    %25 = vector.shape_cast %22 : vector<16x128xf32> to vector<1x16x128xf32>
    tpu.vector_store %arg4[%c0_15, %c0_16, %c0_17], %25 {strides = array<i32>} : memref<1x16x128xf32, #tpu.memory_space<vmem>>, vector<1x16x128xf32>,
    %cst_18 = arith.constant dense<0.000000e+00> : vector<128xf32>
    %26 = vector.multi_reduction <add>, %18, %cst_18 [0] : vector<16x128xf32> to vector<128xf32>
    %27 = vector.shape_cast %26 : vector<128xf32> to vector<1x128xf32>
    %28 = arith.mulf %18, %18 : vector<16x128xf32>
    %cst_19 = arith.constant dense<0.000000e+00> : vector<128xf32>
    %29 = vector.multi_reduction <add>, %28, %cst_19 [0] : vector<16x128xf32> to vector<128xf32>
    %30 = vector.shape_cast %29 : vector<128xf32> to vector<1x128xf32>
    %31 = tpu.concatenate %27, %30 in 0 : vector<1x128xf32>, vector<1x128xf32> -> vector<2x128xf32>
    %c0_20 = arith.constant 0 : index
    %c0_21 = arith.constant 0 : index
    %c0_22 = arith.constant 0 : index
    %32 = vector.load %arg5[%c0_20, %c0_21, %c0_22] : memref<1x2x128xf32, #tpu.memory_space<vmem>>, vector<1x2x128xf32>
    %33 = vector.shape_cast %32 : vector<1x2x128xf32> to vector<2x128xf32>
    %34 = vector.shape_cast %31 : vector<2x128xf32> to vector<1x2x128xf32>
    tpu.vector_store %arg5[%c0_20, %c0_21, %c0_22], %34 {strides = array<i32>} : memref<1x2x128xf32, #tpu.memory_space<vmem>>, vector<1x2x128xf32>,
    return
  }
  func.func @transform_0(%arg0: i32) -> (i32, i32, i32) {
    %c0_i32 = arith.constant 0 : i32
    %c0_i32_0 = arith.constant 0 : i32
    %c0_i32_1 = arith.constant 0 : i32
    return %arg0, %c0_i32, %c0_i32_0 : i32, i32, i32
  }
  func.func @transform_1(%arg0: i32) -> (i32, i32, i32) {
    %c0_i32 = arith.constant 0 : i32
    %c0_i32_0 = arith.constant 0 : i32
    %c0_i32_1 = arith.constant 0 : i32
    %c0_i32_2 = arith.constant 0 : i32
    return %c0_i32, %c0_i32_0, %c0_i32_1 : i32, i32, i32
  }
  func.func @transform_2(%arg0: i32) -> (i32, i32, i32) {
    %c0_i32 = arith.constant 0 : i32
    %c0_i32_0 = arith.constant 0 : i32
    %c0_i32_1 = arith.constant 0 : i32
    return %arg0, %c0_i32, %c0_i32_0 : i32, i32, i32
  }
  func.func @transform_3(%arg0: i32) -> (i32, i32, i32) {
    %c0_i32 = arith.constant 0 : i32
    %c0_i32_0 = arith.constant 0 : i32
    %c0_i32_1 = arith.constant 0 : i32
    return %arg0, %c0_i32, %c0_i32_0 : i32, i32, i32
  }
  func.func @transform_4(%arg0: i32) -> (i32, i32, i32) {
    %c0_i32 = arith.constant 0 : i32
    %c0_i32_0 = arith.constant 0 : i32
    %c0_i32_1 = arith.constant 0 : i32
    return %arg0, %c0_i32, %c0_i32_0 : i32, i32, i32
  }
}

module attributes {stable_mosaic.version = 11 : i64} {
  func.func @_bn1_conv2_kernel(%arg0: i32, %arg1: memref<1x16x128xf32, #tpu.memory_space<vmem>>, %arg2: memref<2x128xf32, #tpu.memory_space<vmem>>, %arg3: memref<3x128x128xf32, #tpu.memory_space<vmem>>, %arg4: memref<1x16x128xf32, #tpu.memory_space<vmem>>, %arg5: memref<1x2x128xf32, #tpu.memory_space<vmem>>) attributes {dimension_semantics = [#tpu.dimension_semantics<parallel>], iteration_bounds = array<i64: 2>, scalar_prefetch = 0 : i64, scratch_operands = 0 : i64, tpu.core_type = #tpu.core_type<tc>, window_params = [{transform_indices = @transform_0, window_bounds = array<i64: 1, 16, 128>}, {pipeline_mode = #tpu.pipeline_mode<synchronous>, transform_indices = @transform_1, window_bounds = array<i64: 2, 128>}, {pipeline_mode = #tpu.pipeline_mode<synchronous>, transform_indices = @transform_2, window_bounds = array<i64: 3, 128, 128>}, {transform_indices = @transform_3, window_bounds = array<i64: 1, 16, 128>}, {transform_indices = @transform_4, window_bounds = array<i64: 1, 2, 128>}]} {
    %c0 = arith.constant 0 : index
    %c0_0 = arith.constant 0 : index
    %0 = vector.load %arg2[%c0, %c0_0] : memref<2x128xf32, #tpu.memory_space<vmem>>, vector<2x128xf32>
    %c0_1 = arith.constant 0 : index
    %c0_2 = arith.constant 0 : index
    %c0_3 = arith.constant 0 : index
    %1 = vector.load %arg1[%c0_1, %c0_2, %c0_3] : memref<1x16x128xf32, #tpu.memory_space<vmem>>, vector<1x16x128xf32>
    %2 = vector.shape_cast %1 : vector<1x16x128xf32> to vector<16x128xf32>
    %3 = vector.extract_strided_slice %0 {offsets = [0, 0], sizes = [1, 128], strides = [1, 1]} : vector<2x128xf32> to vector<1x128xf32>
    %4 = vector.broadcast %3 : vector<1x128xf32> to vector<16x128xf32>
    %5 = arith.mulf %2, %4 : vector<16x128xf32>
    %6 = vector.extract_strided_slice %0 {offsets = [1, 0], sizes = [1, 128], strides = [1, 1]} : vector<2x128xf32> to vector<1x128xf32>
    %7 = vector.broadcast %6 : vector<1x128xf32> to vector<16x128xf32>
    %8 = arith.addf %5, %7 : vector<16x128xf32>
    %cst = arith.constant 0.000000e+00 : f32
    %9 = vector.broadcast %cst : f32 to vector<16x128xf32>
    %10 = arith.maximumf %8, %9 : vector<16x128xf32>
    %cst_4 = arith.constant 0.000000e+00 : f32
    %11 = vector.broadcast %cst_4 : f32 to vector<1x128xf32>
    %12 = vector.extract_strided_slice %10 {offsets = [0, 0], sizes = [15, 128], strides = [1, 1]} : vector<16x128xf32> to vector<15x128xf32>
    %13 = tpu.concatenate %11, %12 in 0 : vector<1x128xf32>, vector<15x128xf32> -> vector<16x128xf32>
    %14 = vector.extract_strided_slice %10 {offsets = [1, 0], sizes = [15, 128], strides = [1, 1]} : vector<16x128xf32> to vector<15x128xf32>
    %15 = tpu.concatenate %14, %11 in 0 : vector<15x128xf32>, vector<1x128xf32> -> vector<16x128xf32>
    %c0_5 = arith.constant 0 : index
    %c0_6 = arith.constant 0 : index
    %c0_7 = arith.constant 0 : index
    %16 = vector.load %arg3[%c0_5, %c0_6, %c0_7] : memref<3x128x128xf32, #tpu.memory_space<vmem>>, vector<1x128x128xf32>
    %17 = vector.shape_cast %16 : vector<1x128x128xf32> to vector<128x128xf32>
    %cst_8 = arith.constant dense<0.000000e+00> : vector<16x128xf32>
    %18 = tpu.matmul %13, %17, %cst_8 {dimension_numbers = #tpu.dot_dimension_numbers<[1], [0], [0], [1], [0, 0, 1, 1], [], []>} : vector<16x128xf32>, vector<128x128xf32>, vector<16x128xf32> -> vector<16x128xf32>
    %c1 = arith.constant 1 : index
    %c0_9 = arith.constant 0 : index
    %c0_10 = arith.constant 0 : index
    %19 = vector.load %arg3[%c1, %c0_9, %c0_10] : memref<3x128x128xf32, #tpu.memory_space<vmem>>, vector<1x128x128xf32>
    %20 = vector.shape_cast %19 : vector<1x128x128xf32> to vector<128x128xf32>
    %cst_11 = arith.constant dense<0.000000e+00> : vector<16x128xf32>
    %21 = tpu.matmul %10, %20, %cst_11 {dimension_numbers = #tpu.dot_dimension_numbers<[1], [0], [0], [1], [0, 0, 1, 1], [], []>} : vector<16x128xf32>, vector<128x128xf32>, vector<16x128xf32> -> vector<16x128xf32>
    %22 = arith.addf %18, %21 : vector<16x128xf32>
    %c2 = arith.constant 2 : index
    %c0_12 = arith.constant 0 : index
    %c0_13 = arith.constant 0 : index
    %23 = vector.load %arg3[%c2, %c0_12, %c0_13] : memref<3x128x128xf32, #tpu.memory_space<vmem>>, vector<1x128x128xf32>
    %24 = vector.shape_cast %23 : vector<1x128x128xf32> to vector<128x128xf32>
    %cst_14 = arith.constant dense<0.000000e+00> : vector<16x128xf32>
    %25 = tpu.matmul %15, %24, %cst_14 {dimension_numbers = #tpu.dot_dimension_numbers<[1], [0], [0], [1], [0, 0, 1, 1], [], []>} : vector<16x128xf32>, vector<128x128xf32>, vector<16x128xf32> -> vector<16x128xf32>
    %26 = arith.addf %22, %25 : vector<16x128xf32>
    %c0_15 = arith.constant 0 : index
    %c0_16 = arith.constant 0 : index
    %c0_17 = arith.constant 0 : index
    %27 = vector.load %arg4[%c0_15, %c0_16, %c0_17] : memref<1x16x128xf32, #tpu.memory_space<vmem>>, vector<1x16x128xf32>
    %28 = vector.shape_cast %27 : vector<1x16x128xf32> to vector<16x128xf32>
    %29 = vector.shape_cast %26 : vector<16x128xf32> to vector<1x16x128xf32>
    tpu.vector_store %arg4[%c0_15, %c0_16, %c0_17], %29 {strides = array<i32>} : memref<1x16x128xf32, #tpu.memory_space<vmem>>, vector<1x16x128xf32>,
    %cst_18 = arith.constant dense<0.000000e+00> : vector<128xf32>
    %30 = vector.multi_reduction <add>, %26, %cst_18 [0] : vector<16x128xf32> to vector<128xf32>
    %31 = vector.shape_cast %30 : vector<128xf32> to vector<1x128xf32>
    %32 = arith.mulf %26, %26 : vector<16x128xf32>
    %cst_19 = arith.constant dense<0.000000e+00> : vector<128xf32>
    %33 = vector.multi_reduction <add>, %32, %cst_19 [0] : vector<16x128xf32> to vector<128xf32>
    %34 = vector.shape_cast %33 : vector<128xf32> to vector<1x128xf32>
    %35 = tpu.concatenate %31, %34 in 0 : vector<1x128xf32>, vector<1x128xf32> -> vector<2x128xf32>
    %c0_20 = arith.constant 0 : index
    %c0_21 = arith.constant 0 : index
    %c0_22 = arith.constant 0 : index
    %36 = vector.load %arg5[%c0_20, %c0_21, %c0_22] : memref<1x2x128xf32, #tpu.memory_space<vmem>>, vector<1x2x128xf32>
    %37 = vector.shape_cast %36 : vector<1x2x128xf32> to vector<2x128xf32>
    %38 = vector.shape_cast %35 : vector<2x128xf32> to vector<1x2x128xf32>
    tpu.vector_store %arg5[%c0_20, %c0_21, %c0_22], %38 {strides = array<i32>} : memref<1x2x128xf32, #tpu.memory_space<vmem>>, vector<1x2x128xf32>,
    return
  }
  func.func @transform_0(%arg0: i32) -> (i32, i32, i32) {
    %c0_i32 = arith.constant 0 : i32
    %c0_i32_0 = arith.constant 0 : i32
    %c0_i32_1 = arith.constant 0 : i32
    return %arg0, %c0_i32, %c0_i32_0 : i32, i32, i32
  }
  func.func @transform_1(%arg0: i32) -> (i32, i32) {
    %c0_i32 = arith.constant 0 : i32
    %c0_i32_0 = arith.constant 0 : i32
    %c0_i32_1 = arith.constant 0 : i32
    return %c0_i32, %c0_i32_0 : i32, i32
  }
  func.func @transform_2(%arg0: i32) -> (i32, i32, i32) {
    %c0_i32 = arith.constant 0 : i32
    %c0_i32_0 = arith.constant 0 : i32
    %c0_i32_1 = arith.constant 0 : i32
    %c0_i32_2 = arith.constant 0 : i32
    return %c0_i32, %c0_i32_0, %c0_i32_1 : i32, i32, i32
  }
  func.func @transform_3(%arg0: i32) -> (i32, i32, i32) {
    %c0_i32 = arith.constant 0 : i32
    %c0_i32_0 = arith.constant 0 : i32
    %c0_i32_1 = arith.constant 0 : i32
    return %arg0, %c0_i32, %c0_i32_0 : i32, i32, i32
  }
  func.func @transform_4(%arg0: i32) -> (i32, i32, i32) {
    %c0_i32 = arith.constant 0 : i32
    %c0_i32_0 = arith.constant 0 : i32
    %c0_i32_1 = arith.constant 0 : i32
    return %arg0, %c0_i32, %c0_i32_0 : i32, i32, i32
  }
}

module attributes {stable_mosaic.version = 11 : i64} {
  func.func @_bn2_add_relu_kernel(%arg0: i32, %arg1: memref<1x16x128xf32, #tpu.memory_space<vmem>>, %arg2: memref<1x16x128xf32, #tpu.memory_space<vmem>>, %arg3: memref<2x128xf32, #tpu.memory_space<vmem>>, %arg4: memref<1x16x128xf32, #tpu.memory_space<vmem>>) attributes {dimension_semantics = [#tpu.dimension_semantics<parallel>], iteration_bounds = array<i64: 2>, scalar_prefetch = 0 : i64, scratch_operands = 0 : i64, tpu.core_type = #tpu.core_type<tc>, window_params = [{transform_indices = @transform_0, window_bounds = array<i64: 1, 16, 128>}, {transform_indices = @transform_1, window_bounds = array<i64: 1, 16, 128>}, {pipeline_mode = #tpu.pipeline_mode<synchronous>, transform_indices = @transform_2, window_bounds = array<i64: 2, 128>}, {transform_indices = @transform_3, window_bounds = array<i64: 1, 16, 128>}]} {
    %c0 = arith.constant 0 : index
    %c0_0 = arith.constant 0 : index
    %0 = vector.load %arg3[%c0, %c0_0] : memref<2x128xf32, #tpu.memory_space<vmem>>, vector<2x128xf32>
    %c0_1 = arith.constant 0 : index
    %c0_2 = arith.constant 0 : index
    %c0_3 = arith.constant 0 : index
    %1 = vector.load %arg1[%c0_1, %c0_2, %c0_3] : memref<1x16x128xf32, #tpu.memory_space<vmem>>, vector<1x16x128xf32>
    %2 = vector.shape_cast %1 : vector<1x16x128xf32> to vector<16x128xf32>
    %3 = vector.extract_strided_slice %0 {offsets = [0, 0], sizes = [1, 128], strides = [1, 1]} : vector<2x128xf32> to vector<1x128xf32>
    %4 = vector.broadcast %3 : vector<1x128xf32> to vector<16x128xf32>
    %5 = arith.mulf %2, %4 : vector<16x128xf32>
    %6 = vector.extract_strided_slice %0 {offsets = [1, 0], sizes = [1, 128], strides = [1, 1]} : vector<2x128xf32> to vector<1x128xf32>
    %7 = vector.broadcast %6 : vector<1x128xf32> to vector<16x128xf32>
    %8 = arith.addf %5, %7 : vector<16x128xf32>
    %c0_4 = arith.constant 0 : index
    %c0_5 = arith.constant 0 : index
    %c0_6 = arith.constant 0 : index
    %9 = vector.load %arg2[%c0_4, %c0_5, %c0_6] : memref<1x16x128xf32, #tpu.memory_space<vmem>>, vector<1x16x128xf32>
    %10 = vector.shape_cast %9 : vector<1x16x128xf32> to vector<16x128xf32>
    %11 = arith.addf %8, %10 : vector<16x128xf32>
    %cst = arith.constant 0.000000e+00 : f32
    %12 = vector.broadcast %cst : f32 to vector<16x128xf32>
    %13 = arith.maximumf %11, %12 : vector<16x128xf32>
    %c0_7 = arith.constant 0 : index
    %c0_8 = arith.constant 0 : index
    %c0_9 = arith.constant 0 : index
    %14 = vector.load %arg4[%c0_7, %c0_8, %c0_9] : memref<1x16x128xf32, #tpu.memory_space<vmem>>, vector<1x16x128xf32>
    %15 = vector.shape_cast %14 : vector<1x16x128xf32> to vector<16x128xf32>
    %16 = vector.shape_cast %13 : vector<16x128xf32> to vector<1x16x128xf32>
    tpu.vector_store %arg4[%c0_7, %c0_8, %c0_9], %16 {strides = array<i32>} : memref<1x16x128xf32, #tpu.memory_space<vmem>>, vector<1x16x128xf32>,
    return
  }
  func.func @transform_0(%arg0: i32) -> (i32, i32, i32) {
    %c0_i32 = arith.constant 0 : i32
    %c0_i32_0 = arith.constant 0 : i32
    %c0_i32_1 = arith.constant 0 : i32
    return %arg0, %c0_i32, %c0_i32_0 : i32, i32, i32
  }
  func.func @transform_1(%arg0: i32) -> (i32, i32, i32) {
    %c0_i32 = arith.constant 0 : i32
    %c0_i32_0 = arith.constant 0 : i32
    %c0_i32_1 = arith.constant 0 : i32
    return %arg0, %c0_i32, %c0_i32_0 : i32, i32, i32
  }
  func.func @transform_2(%arg0: i32) -> (i32, i32) {
    %c0_i32 = arith.constant 0 : i32
    %c0_i32_0 = arith.constant 0 : i32
    %c0_i32_1 = arith.constant 0 : i32
    return %c0_i32, %c0_i32_0 : i32, i32
  }
  func.func @transform_3(%arg0: i32) -> (i32, i32, i32) {
    %c0_i32 = arith.constant 0 : i32
    %c0_i32_0 = arith.constant 0 : i32
    %c0_i32_1 = arith.constant 0 : i32
    return %arg0, %c0_i32, %c0_i32_0 : i32, i32, i32
  }
}

</mosaic_0001>

<bundles_post_ra>
// kernel: tile.27
= control target key start
LH: loop header
LB: loop body
LE: loop exit
PB: predicated region body
PF: predicated region fallthrough
CT: control target
= control target key end

     0   :  { %s28_s0 = inlined_call_operand.vmem [shape: f32[8], index: 0, kind: input, shape index: {}]   ;;  %s29_s1 = inlined_call_operand.vmem [shape: f32[16,8], index: 1, kind: output, shape index: {}]  }
   0x1   :  { %v4_v0 = vld [vmem:[%s28_s0] ss:$0 sm:$0xff] }
   0x2   :  { %5 = vst [vmem:[%s29_s1] sm:$0xff] %v4_v0  ;;  %8 = vst [vmem:[%s29_s1 + $0x8] sm:$0xff] %v4_v0 }

// kernel: tile.29
= control target key start
LH: loop header
LB: loop body
LE: loop exit
PB: predicated region body
PF: predicated region fallthrough
CT: control target
= control target key end

     0   :  { %s133_s10 = smov 120   ;;  %s134_s11 = smov 104   ;;  %vm3_vm0 = vcmask 64512   ;;  %vm9_vm1 = vcmask 1048512   ;;  %vm15_vm2 = vcmask 982912   ;;  %vm21_vm3 = vcmask 917312   ;;  %s209_s0 = inlined_call_operand.vmem [shape: f32[16,8], index: 0, kind: input, shape index: {}]   ;;  %s210_s1 = inlined_call_operand.vmem [shape: f32[1,128], index: 1, kind: output, shape index: {}]  }
   0x1   :  { %v103_v0 = vld [vmem:[%s209_s0 + $0xf] sm:$0x1]   ;;  %v105_v1 = vld [vmem:[%s209_s0 + $0xd] sm:$0x1]   ;;  %v104_v2 = vld [vmem:[%s209_s0 + $0xe] sm:$0x1]  }
   0x2   :  { %7 = vrot.lane.b32.xlu0 %v103_v0, %s133_s10  ;;  %19 = vrot.lane.b32.xlu1 %v105_v1, %s134_s11  ;;  %v106_v3 = vld [vmem:[%s209_s0 + $0xc] sm:$0x1]   ;;  %s135_s16 = smov 112   ;;  %s136_s17 = smov 96   ;;  %v107_v4 = vld [vmem:[%s209_s0 + $0xb] sm:$0x1]  }
   0x3   :  { %v108_v5 = vld [vmem:[%s209_s0 + $0xa] sm:$0x1]   ;;  %v2_v6 = vld [vmem:[%s209_s0] sm:$0x1]   ;;  %s137_s24 = smov 88   ;;  %s138_s25 = smov 80  }
   0x4   :  { %4 = vst.msk [vmem:[#allocation0] sm:$0x1] %vm3_vm0, %v2_v6   ;;  %v109_v7 = vld [vmem:[%s209_s0 + $0x9] sm:$0x1]   ;;  %v110_v8 = vld [vmem:[%s209_s0 + $0x8] sm:$0x1]  }
   0x5   :  { %s139_s30 = smov 72   ;;  %s140_s2 = smov 64   ;;  %v111_v9 = vld [vmem:[%s209_s0 + $0x7] sm:$0x1]   ;;  %v112_v10 = vld [vmem:[%s209_s0 + $0x6] sm:$0x1]  }
   0x6   :  { %13 = vrot.lane.b32.xlu0 %v104_v2, %s135_s16  ;;  %25 = vrot.lane.b32.xlu1 %v106_v3, %s136_s17  ;;  %s141_s7 = smov 56   ;;  %s142_s8 = smov 48   ;;  %v113_v11 = vld [vmem:[%s209_s0 + $0x5] sm:$0x1]   ;;  %v114_v12 = vld [vmem:[%s209_s0 + $0x4] sm:$0x1]  }
   0x7   :  { %s143_s13 = smov 40   ;;  %s144_s14 = smov 32   ;;  %v115_v13 = vld [vmem:[%s209_s0 + $0x3] sm:$0x1]   ;;  %v116_v14 = vld [vmem:[%s209_s0 + $0x2] sm:$0x1]  }
   0x8   :  { %s145_s19 = smov 24   ;;  %s146_s20 = smov 16   ;;  %v117_v15 = vld [vmem:[%s209_s0 + $0x1] sm:$0x1]   ;;  %vm27_vm4 = vcmask 851712   ;;  %vm33_vm5 = vcmask 786112  }
   0x9   :  { %s147_s0 = smov 8   ;;  %vm39_vm6 = vcmask 720512   ;;  %vm45_vm7 = vcmask 654912   ;;  %vm51_vm8 = vcmask 589312   ;;  %vm57_vm9 = vcmask 523712  }
   0xa   :  { %31 = vrot.lane.b32.xlu0 %v107_v4, %s137_s24  ;;  %37 = vrot.lane.b32.xlu1 %v108_v5, %s138_s25  ;;  %vm63_vm10 = vcmask 458112   ;;  %vm69_vm11 = vcmask 392512   ;;  %vm75_vm12 = vcmask 326912   ;;  %vm81_vm13 = vcmask 261312  }
   0xb   :  { %vm87_vm14 = vcmask 195712   ;;  %vm93_vm15 = vcmask 130112  }
   0xe   :  { %43 = vrot.lane.b32.xlu0 %v109_v7, %s139_s30  ;;  %49 = vrot.lane.b32.xlu1 %v110_v8, %s140_s2 }
  0x12   :  { %55 = vrot.lane.b32.xlu0 %v111_v9, %s141_s7  ;;  %61 = vrot.lane.b32.xlu1 %v112_v10, %s142_s8 }
  0x16   :  { %67 = vrot.lane.b32.xlu0 %v113_v11, %s143_s13  ;;  %73 = vrot.lane.b32.xlu1 %v114_v12, %s144_s14 }
  0x1a   :  { %79 = vrot.lane.b32.xlu0 %v115_v13, %s145_s19  ;;  %85 = vrot.lane.b32.xlu1 %v116_v14, %s146_s20 }
  0x1e   :  { %91 = vrot.lane.b32.xlu0 %v117_v15, %s147_s0 }
  0x74   :  { %v8_v16 = vpop.permute.xlu0 %7   ;;  %v20_v17 = vpop.permute.xlu1 %19  }
  0x75   :  { %10 = vst.msk [vmem:[#allocation0] sm:$0x1] %vm9_vm1, %v8_v16  }
  0x78   :  { %v14_v18 = vpop.permute.xlu0 %13   ;;  %v26_v19 = vpop.permute.xlu1 %25  }
  0x79   :  { %16 = vst.msk [vmem:[#allocation0] sm:$0x1] %vm15_vm2, %v14_v18  }
  0x7a   :  { %22 = vst.msk [vmem:[#allocation0] sm:$0x1] %vm21_vm3, %v20_v17  }
  0x7b   :  { %28 = vst.msk [vmem:[#allocation0] sm:$0x1] %vm27_vm4, %v26_v19  }
  0x7c   :  { %v32_v20 = vpop.permute.xlu0 %31   ;;  %v38_v21 = vpop.permute.xlu1 %37  }
  0x7d   :  { %34 = vst.msk [vmem:[#allocation0] sm:$0x1] %vm33_vm5, %v32_v20  }
  0x7e   :  { %40 = vst.msk [vmem:[#allocation0] sm:$0x1] %vm39_vm6, %v38_v21  }
  0x80   :  { %v44_v22 = vpop.permute.xlu0 %43   ;;  %v50_v23 = vpop.permute.xlu1 %49  }
  0x81   :  { %46 = vst.msk [vmem:[#allocation0] sm:$0x1] %vm45_vm7, %v44_v22  }
  0x82   :  { %52 = vst.msk [vmem:[#allocation0] sm:$0x1] %vm51_vm8, %v50_v23  }
  0x84   :  { %v56_v24 = vpop.permute.xlu0 %55   ;;  %v62_v25 = vpop.permute.xlu1 %61  }
  0x85   :  { %58 = vst.msk [vmem:[#allocation0] sm:$0x1] %vm57_vm9, %v56_v24  }
  0x86   :  { %64 = vst.msk [vmem:[#allocation0] sm:$0x1] %vm63_vm10, %v62_v25  }
  0x88   :  { %v68_v26 = vpop.permute.xlu0 %67   ;;  %v74_v27 = vpop.permute.xlu1 %73  }
  0x89   :  { %70 = vst.msk [vmem:[#allocation0] sm:$0x1] %vm69_vm11, %v68_v26  }
  0x8a   :  { %76 = vst.msk [vmem:[#allocation0] sm:$0x1] %vm75_vm12, %v74_v27  }
  0x8c   :  { %v80_v28 = vpop.permute.xlu0 %79   ;;  %v86_v29 = vpop.permute.xlu1 %85  }
  0x8d   :  { %82 = vst.msk [vmem:[#allocation0] sm:$0x1] %vm81_vm13, %v80_v28  }
  0x8e   :  { %88 = vst.msk [vmem:[#allocation0] sm:$0x1] %vm87_vm14, %v86_v29  }
  0x90   :  { %v92_v30 = vpop.permute.xlu0 %91  }
  0x91   :  { %94 = vst.msk [vmem:[#allocation0] sm:$0x1] %vm93_vm15, %v92_v30  }
  0x98   :  { %v99_v31 = vld [vmem:[#allocation0] sm:$0x1] }
  0x99   :  { %102 = vst [vmem:[%s210_s1] sm:$0x1] %v99_v31 }

// kernel: residual_block_forward.3
= control target key start
LH: loop header
LB: loop body
LE: loop exit
PB: predicated region body
PF: predicated region fallthrough
CT: control target
= control target key end

     0   :  { %s792_s15 = smov 0   ;;  %s992_s0 = inlined_call_operand.vmem [shape: f32[2,16,64], index: 0, kind: input, shape index: {}]   ;;  %s993_s1 = inlined_call_operand.vmem [shape: f32[3,64,256], index: 1, kind: input, shape index: {}]   ;;  %s994_s2 = inlined_call_operand.vmem [shape: f32[2,16,128], index: 2, kind: output, shape index: {0}]   ;;  %s995_s3 = inlined_call_operand.vmem [shape: f32[2,16,128], index: 3, kind: output, shape index: {1}]   ;;  %s996_s4 = inlined_call_operand.vmem [shape: f32[2,2,128], index: 4, kind: output, shape index: {2}]  }
   0x1 LB: > { %s678_s16 = sadd.s32 4294967295, %s764_s15   ;;  %p682_p0 = scmp.ge.s32.totalorder %s764_s15, 1  ;;  %s764_s15 = sphi %s792_s15, %s15_s15  }
   0x2   : > { %p167_p1 = scmp.lt.s32.totalorder %s764_s15, 3 }
   0x4   : > { %p168_p2 = pnand %p682_p0, %p167_p1 }
   0x5   : > { %p202_p3 = scmp.lt.s32.totalorder (!%p168_p2), %s678_s16, 1 }
   0x6   : > { %171 = sbr.rel (%p168_p2) target bundleno = 263 (0x107), region = 28 }
   0xb   : > { %v705_v0 = vld [vmem:[%s993_s1 + $0xf8] sm:$0xff]  ;;  %v704_v2 = vld [vmem:[%s993_s1 + $0xf0] sm:$0xff]  ;;  %v703_v4 = vld [vmem:[%s993_s1 + $0xe8] sm:$0xff]  ;;  %s998_s16 = smov (!%p202_p3, %s678_s16), 1  ;;  %vm225_vm0 = vcmask 1040384   ;;  %vm270_vm1 = vcmask 523264  }
   0xc   : > { %v252_v1 = vld [vmem:[%s993_s1 + $0x78] sm:$0xff]  ;;  %291 = vmatprep.subr.mxu0 %v705_v0  ;;  %v251_v3 = vld [vmem:[%s993_s1 + $0x70] sm:$0xff]  ;;  %v250_v5 = vld [vmem:[%s993_s1 + $0x68] sm:$0xff]  ;;  %s845_s21 = sshll.u32 %s998_s16, 4  ;;  %v766_v35 = vmov 0.0   ;;  %vm231_vm2 = vcmask 1046528  }
   0xd   : > { %373 = vmatprep.subr.mxu1 %v252_v1  ;;  %292 = vmatpush1.msra.mxu0 %v704_v2  ;;  %v702_v6 = vld [vmem:[%s993_s1 + $0xe0] sm:$0xff]  ;;  %v701_v8 = vld [vmem:[%s993_s1 + $0xd8] sm:$0xff]  ;;  %v700_v10 = vld [vmem:[%s993_s1 + $0xd0] sm:$0xff]  ;;  %s869_s10 = scalar_lea.vmem %s992_s0, %s845_s21  ;;  %s211_s27 = scalar_lea.vmem %s994_s2, %s845_s21 }
   0xe   : > { %374 = vmatpush1.msra.mxu1 %v251_v3  ;;  %v249_v7 = vld [vmem:[%s993_s1 + $0x60] sm:$0xff]  ;;  %293 = vmatprep.subr.mxu0 %v703_v4  ;;  %v248_v9 = vld [vmem:[%s993_s1 + $0x58] sm:$0xff]  ;;  %v247_v11 = vld [vmem:[%s993_s1 + $0x50] sm:$0xff]  ;;  %s216_s30 = scalar_lea.vmem %s995_s3, %s845_s21  ;;  %s689_s21 = sshll.u32 %s998_s16, 1 }
   0xf   : > { %375 = vmatprep.subr.mxu1 %v250_v5  ;;  %294 = vmatpush1.msra.mxu0 %v702_v6  ;;  %v699_v12 = vld [vmem:[%s993_s1 + $0xc8] sm:$0xff]  ;;  %v698_v14 = vld [vmem:[%s993_s1 + $0xc0] sm:$0xff]  ;;  %v697_v16 = vld [vmem:[%s993_s1 + $0xb8] sm:$0xff]  ;;  %s220_s6 = scalar_lea.vmem %s996_s4, %s689_s21 }
  0x10   : > { %376 = vmatpush1.msra.mxu1 %v249_v7  ;;  %v246_v13 = vld [vmem:[%s993_s1 + $0x48] sm:$0xff]  ;;  %295 = vmatprep.subr.mxu0 %v701_v8  ;;  %v245_v15 = vld [vmem:[%s993_s1 + $0x40] sm:$0xff]  ;;  %v244_v17 = vld [vmem:[%s993_s1 + $0x38] sm:$0xff] }
  0x11   : > { %377 = vmatprep.subr.mxu1 %v248_v9  ;;  %296 = vmatpush1.msra.mxu0 %v700_v10  ;;  %v696_v18 = vld [vmem:[%s993_s1 + $0xb0] sm:$0xff]  ;;  %v695_v20 = vld [vmem:[%s993_s1 + $0xa8] sm:$0xff]  ;;  %v694_v22 = vld [vmem:[%s993_s1 + $0xa0] sm:$0xff] }
  0x12   : > { %378 = vmatpush1.msra.mxu1 %v247_v11  ;;  %297 = vmatprep.subr.mxu0 %v699_v12  ;;  %v243_v19 = vld [vmem:[%s993_s1 + $0x30] sm:$0xff]  ;;  %v242_v21 = vld [vmem:[%s993_s1 + $0x28] sm:$0xff]  ;;  %v241_v23 = vld [vmem:[%s993_s1 + $0x20] sm:$0xff] }
  0x13   : > { %379 = vmatprep.subr.mxu1 %v246_v13  ;;  %298 = vmatpush1.msra.mxu0 %v698_v14  ;;  %v693_v24 = vld [vmem:[%s993_s1 + $0x98] sm:$0xff]  ;;  %v890_v26 = vld [vmem:[%s869_s10] sm:$0xff]  ;;  %v692_v27 = vld [vmem:[%s993_s1 + $0x90] sm:$0xff] }
  0x14   : > { %380 = vmatpush1.msra.mxu1 %v245_v15  ;;  %299 = vmatprep.subr.mxu0 %v697_v16  ;;  %v240_v25 = vld [vmem:[%s993_s1 + $0x18] sm:$0xff]  ;;  %v239_v28 = vld [vmem:[%s993_s1 + $0x10] sm:$0xff]  ;;  %v226_v29 = vrot.slane %v890_v26, 7  ;;  %v691_v30 = vld [vmem:[%s993_s1 + $0x88] sm:$0xff]  ;;  %v232_v52 = vrot.slane %v890_v26, 1 }
  0x15   : > { %381 = vmatprep.subr.mxu1 %v244_v17  ;;  %300 = vmatpush1.msra.mxu0 %v696_v18  ;;  %v238_v31 = vld [vmem:[%s993_s1 + $0x8] sm:$0xff]  ;;  %v690_v32 = vld [vmem:[%s993_s1 + $0x80] sm:$0xff]  ;;  %v725_v36 = vld [vmem:[%s993_s1 + $0x178] sm:$0xff] }
  0x16   : > { %382 = vmatpush1.msra.mxu1 %v243_v19  ;;  %301 = vmatprep.subr.mxu0 %v695_v20  ;;  %v237_v33 = vld [vmem:[%s993_s1] sm:$0xff]  ;;  %v230_v34 = vsel %vm225_vm0, 0.0, %v226_v29  ;;  %v724_v37 = vld [vmem:[%s993_s1 + $0x170] sm:$0xff]  ;;  %v723_v38 = vld [vmem:[%s993_s1 + $0x168] sm:$0xff] }
  0x17   : > { %383 = vmatprep.subr.mxu1 %v242_v21  ;;  %302 = vmatpush1.msra.mxu0 %v694_v22  ;;  %v722_v39 = vld [vmem:[%s993_s1 + $0x160] sm:$0xff]  ;;  %v721_v40 = vld [vmem:[%s993_s1 + $0x158] sm:$0xff]  ;;  %v222_v41 = vld [vmem:[%s869_s10 + $0x8] sm:$0xff] }
  0x18   : > { %384 = vmatpush1.msra.mxu1 %v241_v23  ;;  %303 = vmatprep.subr.mxu0 %v693_v24  ;;  %v720_v42 = vld [vmem:[%s993_s1 + $0x150] sm:$0xff]  ;;  %v719_v43 = vld [vmem:[%s993_s1 + $0x148] sm:$0xff]  ;;  %v718_v44 = vld [vmem:[%s993_s1 + $0x140] sm:$0xff]  ;;  %v227_v45 = vrot.slane %v222_v41, 7  ;;  %v233_v53 = vrot.slane %v222_v41, 1 }
  0x19   : > { %385 = vmatprep.subr.mxu1 %v240_v25  ;;  %304 = vmatpush1.msra.mxu0 %v692_v27  ;;  %v717_v46 = vld [vmem:[%s993_s1 + $0x138] sm:$0xff]  ;;  %v716_v47 = vld [vmem:[%s993_s1 + $0x130] sm:$0xff]  ;;  %v715_v49 = vld [vmem:[%s993_s1 + $0x128] sm:$0xff] }
  0x1a   : > { %386 = vmatpush1.msra.mxu1 %v239_v28  ;;  %305 = vmatprep.subr.mxu0 %v691_v30  ;;  %v228_v48 = vsel %vm225_vm0, %v226_v29, %v227_v45  ;;  %v714_v50 = vld [vmem:[%s993_s1 + $0x120] sm:$0xff]  ;;  %v713_v51 = vld [vmem:[%s993_s1 + $0x118] sm:$0xff]  ;;  %v712_v54 = vld [vmem:[%s993_s1 + $0x110] sm:$0xff]  ;;  %v236_v57 = vsel %vm231_vm2, %v233_v53, 0.0  ;;  %v234_v58 = vsel %vm231_vm2, %v232_v52, %v233_v53 }
  0x1b   : > { %387 = vmatprep.subr.mxu1 %v238_v31  ;;  %306 = vmatpush1.msra.mxu0 %v690_v32  ;;  %v711_v55 = vld [vmem:[%s993_s1 + $0x108] sm:$0xff]  ;;  %v710_v56 = vld [vmem:[%s993_s1 + $0x100] sm:$0xff] }
  0x1c   : > { %339 = vmatprep.mubr.f32.mxu0 %v766_v35  ;;  %388 = vmatpush1.msra.mxu1 %v237_v33 }
  0x1d   : > { %421 = vmatprep.mubr.f32.mxu1 %v766_v35  ;;  %706 = vmatmul.mubr.msk.f32.vlgmr.msra.gmra.mxu0 %vm270_vm1, %v890_v26 }
  0x1e   : > { %708 = vmatmul.mubr.msk.f32.vlgmr.msra.gmra.mxu1 %vm270_vm1, %v230_v34  ;;  %472 = vmatprep.subr.mxu0 %v725_v36 }
  0x1f   : > { %733 = vmatprep.subr.mxu1 %v725_v36  ;;  %473 = vmatpush1.msra.mxu0 %v724_v37 }
  0x20   : > { %741 = vmatpush1.msra.mxu1 %v724_v37  ;;  %474 = vmatprep.subr.mxu0 %v723_v38 }
  0x21   : > { %734 = vmatprep.subr.mxu1 %v723_v38  ;;  %475 = vmatpush1.msra.mxu0 %v722_v39 }
  0x22   : > { %742 = vmatpush1.msra.mxu1 %v722_v39  ;;  %476 = vmatprep.subr.mxu0 %v721_v40 }
  0x23   : > { %735 = vmatprep.subr.mxu1 %v721_v40  ;;  %477 = vmatpush1.msra.mxu0 %v720_v42 }
  0x24   : > { %743 = vmatpush1.msra.mxu1 %v720_v42  ;;  %478 = vmatprep.subr.mxu0 %v719_v43 }
  0x25   : > { %736 = vmatprep.subr.mxu1 %v719_v43  ;;  %479 = vmatpush1.msra.mxu0 %v718_v44 }
  0x26   : > { %744 = vmatpush1.msra.mxu1 %v718_v44  ;;  %480 = vmatprep.subr.mxu0 %v717_v46 }
  0x27   : > { %737 = vmatprep.subr.mxu1 %v717_v46  ;;  %345 = vmatprep.mubr.f32.mxu0 %v766_v35 }
  0x28   : > { %427 = vmatprep.mubr.f32.mxu1 %v766_v35  ;;  %481 = vmatpush1.msra.mxu0 %v716_v47 }
  0x29   : > { %745 = vmatpush1.msra.mxu1 %v716_v47  ;;  %707 = vmatmul.mubr.msk.f32.gmra.mxu0 %vm270_vm1, %v222_v41 }
  0x2a   : > { %709 = vmatmul.mubr.msk.f32.gmra.mxu1 %vm270_vm1, %v228_v48  ;;  %482 = vmatprep.subr.mxu0 %v715_v49 }
  0x2b   : > { %738 = vmatprep.subr.mxu1 %v715_v49  ;;  %483 = vmatpush1.msra.mxu0 %v714_v50 }
  0x2c   : > { %746 = vmatpush1.msra.mxu1 %v714_v50  ;;  %484 = vmatprep.subr.mxu0 %v713_v51 }
  0x2d   : > { %739 = vmatprep.subr.mxu1 %v713_v51  ;;  %485 = vmatpush1.msra.mxu0 %v712_v54 }
  0x2e   : > { %747 = vmatpush1.msra.mxu1 %v712_v54  ;;  %486 = vmatprep.subr.mxu0 %v711_v55 }
  0x2f   : > { %740 = vmatprep.subr.mxu1 %v711_v55  ;;  %487 = vmatpush1.msra.mxu0 %v710_v56 }
  0x30   : > { %748 = vmatpush1.msra.mxu1 %v710_v56  ;;  %520 = vmatprep.mubr.f32.mxu0 %v766_v35 }
  0x31   : > { %526 = vmatprep.mubr.f32.mxu1 %v766_v35  ;;  %726 = vmatmul.mubr.msk.f32.vlgmr.msra.gmra.mxu0 %vm270_vm1, %v234_v58 }
  0x32   : > { %727 = vmatmul.mubr.msk.f32.vlgmr.msra.gmra.mxu1 %vm270_vm1, %v236_v57 }
  0xdd   : > { %v341_v59 = vpop.f32.mrf.mxu0 }
  0xde   : > { %v423_v60 = vpop.f32.mrf.mxu1 }
  0xdf   : > { %v343_v61 = vpop.f32.mrf.mxu0  ;;  %v424_v3 = vadd.f32 %v423_v60, %v341_v59 }
  0xe0   : > { %v425_v62 = vpop.f32.mrf.mxu1 }
  0xe1   : > { %v426_v7 = vadd.f32 %v425_v62, %v343_v61 }
  0xe9   : > { %v347_v63 = vpop.f32.mrf.mxu0 }
  0xea   : > { %v429_v0 = vpop.f32.mrf.mxu1 }
  0xeb   : > { %v349_v1 = vpop.f32.mrf.mxu0  ;;  %v430_v4 = vadd.f32 %v429_v0, %v347_v63 }
  0xec   : > { %v431_v2 = vpop.f32.mrf.mxu1 }
  0xed   : > { %v432_v10 = vadd.f32 %v431_v2, %v349_v1 }
  0xf1   : > { %v522_v5 = vpop.f32.mrf.mxu0 }
  0xf2   : > { %v528_v6 = vpop.f32.mrf.mxu1  ;;  %v533_v8 = vadd.f32 %v522_v5, %v424_v3 }
  0xf3   : > { %v535_v9 = vadd.f32 %v528_v6, %v430_v4  ;;  %v524_v11 = vpop.f32.mrf.mxu0 }
  0xf4   : > { %v530_v12 = vpop.f32.mrf.mxu1  ;;  %537 = vst [vmem:[%s211_s27] sm:$0xff] %v533_v8  ;;  %v548_v13 = vmul.f32 %v533_v8, %v533_v8  ;;  %v534_v16 = vadd.f32 %v524_v11, %v426_v7 }
  0xf5   : > { %538 = vst [vmem:[%s211_s27 + $0x8] sm:$0xff] %v535_v9  ;;  %v541_v14 = vadd.f32 %v535_v9, %v533_v8  ;;  %v549_v15 = vmul.f32 %v535_v9, %v535_v9  ;;  %v536_v17 = vadd.f32 %v530_v12, %v432_v10 }
  0xf6   : > { %539 = vst [vmem:[%s216_s30] sm:$0xff] %v534_v16 }
  0xf7   : > { %v542_v18 = vrot.slane %v541_v14, 4  ;;  %v550_v19 = vadd.f32 %v549_v15, %v548_v13  ;;  %540 = vst [vmem:[%s216_s30 + $0x8] sm:$0xff] %v536_v17 }
  0xf9   : > { %v543_v20 = vadd.f32 %v542_v18, %v541_v14  ;;  %v551_v21 = vrot.slane %v550_v19, 4 }
  0xfb   : > { %v544_v22 = vrot.slane %v543_v20, 2  ;;  %v552_v23 = vadd.f32 %v551_v21, %v550_v19 }
  0xfd   : > { %v545_v24 = vadd.f32 %v544_v22, %v543_v20  ;;  %v553_v25 = vrot.slane %v552_v23, 2 }
  0xff   : > { %v546_v26 = vrot.slane %v545_v24, 1  ;;  %v554_v27 = vadd.f32 %v553_v25, %v552_v23 }
 0x101   : > { %v555_v28 = vrot.slane %v554_v27, 1  ;;  %v547_v29 = vadd.f32 %v546_v26, %v545_v24 }
 0x103   : > { %v556_v30 = vadd.f32 %v555_v28, %v554_v27 }
 0x105   : > { %v557_v31 = vsel %vm225_vm0, %v547_v29, %v556_v30 }
 0x106   : > { %558 = vst [vmem:[%s220_s6] sm:$0x3] %v557_v31 }
 0x107 PF: > { %s15_s15 = sadd.s32 1, %s764_s15  }
 0x108   : > { %p12_p4 = scmp.ge.s32.totalorder %s15_s15, 4  }
 0x10a   :  { %14 = sbr.rel (!%p12_p4) target bundleno = 1 (0x1), region = 84 }

// kernel: residual_block_forward.4
= control target key start
LH: loop header
LB: loop body
LE: loop exit
PB: predicated region body
PF: predicated region fallthrough
CT: control target
= control target key end

     0   :  { %s874_s15 = smov 0   ;;  %s1063_s0 = inlined_call_operand.vmem [shape: f32[2,16,128], index: 0, kind: input, shape index: {}]   ;;  %s1064_s1 = inlined_call_operand.vmem [shape: f32[2,128], index: 1, kind: input, shape index: {}]   ;;  %s1065_s2 = inlined_call_operand.vmem [shape: f32[3,128,128], index: 2, kind: input, shape index: {}]   ;;  %s1066_s3 = inlined_call_operand.vmem [shape: f32[2,16,128], index: 3, kind: output, shape index: {0}]   ;;  %s1067_s4 = inlined_call_operand.vmem [shape: f32[2,2,128], index: 4, kind: output, shape index: {1}]  }
   0x1 LB: > { %s625_s16 = sadd.s32 4294967295, %s847_s15   ;;  %p629_p0 = scmp.ge.s32.totalorder %s847_s15, 1  ;;  %s847_s15 = sphi %s874_s15, %s15_s15  }
   0x2   : > { %p165_p1 = scmp.lt.s32.totalorder %s847_s15, 3 }
   0x4   : > { %p166_p2 = pnand %p629_p0, %p165_p1 }
   0x5   : > { %p195_p3 = scmp.lt.s32.totalorder (!%p166_p2), %s625_s16, 1 }
   0x6   : > { %169 = sbr.rel (%p166_p2) target bundleno = 293 (0x125), region = 32 }
   0xb   : > { %v650_v0 = vld [vmem:[%s1065_s2 + $0xf8] sm:$0xff]  ;;  %v649_v2 = vld [vmem:[%s1065_s2 + $0xf0] sm:$0xff]  ;;  %v212_v3 = vlaneseq  ;;  %v648_v5 = vld [vmem:[%s1065_s2 + $0xe8] sm:$0xff]  ;;  %s1069_s16 = smov (!%p195_p3, %s625_s16), 1  ;;  %vm228_vm0 = vcmask 1040384   ;;  %vm235_vm1 = vcmask 1046528  }
   0xc   : > { %v257_v1 = vld [vmem:[%s1065_s2 + $0x78] sm:$0xff]  ;;  %728 = vmatprep.subr.mxu0 %v650_v0  ;;  %v256_v4 = vld [vmem:[%s1065_s2 + $0x70] sm:$0xff]  ;;  %v255_v6 = vld [vmem:[%s1065_s2 + $0x68] sm:$0xff]  ;;  %s672_s11 = sshll.u32 %s1069_s16, 4 }
   0xd   : > { %763 = vmatprep.subr.mxu1 %v257_v1  ;;  %729 = vmatpush3.msra.mxu0 %v650_v0  ;;  %v213_v7 = vshrl.u32 %v212_v3, 7  ;;  %v647_v8 = vld [vmem:[%s1065_s2 + $0xe0] sm:$0xff]  ;;  %v646_v10 = vld [vmem:[%s1065_s2 + $0xd8] sm:$0xff]  ;;  %v645_v13 = vld [vmem:[%s1065_s2 + $0xd0] sm:$0xff]  ;;  %s199_s20 = scalar_lea.vmem %s1063_s0, %s672_s11  ;;  %s204_s28 = scalar_lea.vmem %s1066_s3, %s672_s11 }
   0xe   : > { %764 = vmatpush3.msra.mxu1 %v257_v1  ;;  %730 = vmatprep.subr.mxu0 %v649_v2  ;;  %v254_v9 = vld [vmem:[%s1065_s2 + $0x60] sm:$0xff]  ;;  %v253_v11 = vld [vmem:[%s1065_s2 + $0x58] sm:$0xff]  ;;  %v252_v14 = vld [vmem:[%s1065_s2 + $0x50] sm:$0xff]  ;;  %s634_s11 = sshll.u32 %s1069_s16, 1 }
   0xf   : > { %765 = vmatprep.subr.mxu1 %v256_v4  ;;  %731 = vmatpush3.msra.mxu0 %v649_v2  ;;  %v214_v12 = vsub.s32 0, %v213_v7  ;;  %v644_v15 = vld [vmem:[%s1065_s2 + $0xc8] sm:$0xff]  ;;  %v209_v17 = vld [vmem:[%s1064_s1] sm:$0x3]  ;;  %v220_v20 = vsub.s32 1, %v213_v7  ;;  %v642_v24 = vld [vmem:[%s1065_s2 + $0xb8] sm:$0xff]  ;;  %s208_s5 = scalar_lea.vmem %s1067_s4, %s634_s11 }
  0x10   : > { %766 = vmatpush3.msra.mxu1 %v256_v4  ;;  %732 = vmatprep.subr.mxu0 %v648_v5  ;;  %v251_v16 = vld [vmem:[%s1065_s2 + $0x48] sm:$0xff]  ;;  %v643_v18 = vld [vmem:[%s1065_s2 + $0xc0] sm:$0xff]  ;;  %v249_v25 = vld [vmem:[%s1065_s2 + $0x38] sm:$0xff] }
  0x11   : > { %767 = vmatprep.subr.mxu1 %v255_v6  ;;  %733 = vmatpush3.msra.mxu0 %v648_v5  ;;  %v215_v19 = vrot.slane %v209_v17, %v214_v12  ;;  %v250_v21 = vld [vmem:[%s1065_s2 + $0x40] sm:$0xff]  ;;  %v211_v23 = vld [vmem:[%s199_s20 + $0x8] sm:$0xff]  ;;  %v221_v27 = vrot.slane %v209_v17, %v220_v20  ;;  %v641_v29 = vld [vmem:[%s1065_s2 + $0xb0] sm:$0xff] }
  0x12   : > { %768 = vmatpush3.msra.mxu1 %v255_v6  ;;  %734 = vmatprep.subr.mxu0 %v647_v8  ;;  %v210_v22 = vld [vmem:[%s199_s20] sm:$0xff]  ;;  %v248_v30 = vld [vmem:[%s1065_s2 + $0x30] sm:$0xff]  ;;  %v640_v31 = vld [vmem:[%s1065_s2 + $0xa8] sm:$0xff] }
  0x13   : > { %769 = vmatprep.subr.mxu1 %v254_v9  ;;  %735 = vmatpush3.msra.mxu0 %v647_v8  ;;  %v216_v26 = vmul.f32 %v215_v19, %v210_v22  ;;  %v217_v28 = vmul.f32 %v215_v19, %v211_v23  ;;  %v247_v32 = vld [vmem:[%s1065_s2 + $0x28] sm:$0xff]  ;;  %v639_v35 = vld [vmem:[%s1065_s2 + $0xa0] sm:$0xff]  ;;  %v638_v37 = vld [vmem:[%s1065_s2 + $0x98] sm:$0xff] }
  0x14   : > { %770 = vmatpush3.msra.mxu1 %v254_v9  ;;  %736 = vmatprep.subr.mxu0 %v646_v10  ;;  %v246_v36 = vld [vmem:[%s1065_s2 + $0x20] sm:$0xff]  ;;  %v245_v38 = vld [vmem:[%s1065_s2 + $0x18] sm:$0xff]  ;;  %v637_v41 = vld [vmem:[%s1065_s2 + $0x90] sm:$0xff] }
  0x15   : > { %771 = vmatprep.subr.mxu1 %v253_v11  ;;  %737 = vmatpush3.msra.mxu0 %v646_v10  ;;  %v222_v33 = vadd.f32 %v221_v27, %v216_v26  ;;  %v223_v34 = vadd.f32 %v221_v27, %v217_v28  ;;  %v244_v42 = vld [vmem:[%s1065_s2 + $0x10] sm:$0xff]  ;;  %v636_v43 = vld [vmem:[%s1065_s2 + $0x88] sm:$0xff]  ;;  %v635_v47 = vld [vmem:[%s1065_s2 + $0x80] sm:$0xff] }
  0x16   : > { %772 = vmatpush3.msra.mxu1 %v253_v11  ;;  %738 = vmatprep.subr.mxu0 %v645_v13  ;;  %v243_v44 = vld [vmem:[%s1065_s2 + $0x8] sm:$0xff]  ;;  %v242_v48 = vld [vmem:[%s1065_s2] sm:$0xff]  ;;  %vm651_vm2 = vmneg %vm228_vm0 }
  0x17   : > { %773 = vmatprep.subr.mxu1 %v252_v14  ;;  %739 = vmatpush3.msra.mxu0 %v645_v13  ;;  %v224_v39 = vmax.f32 %v222_v33, 0.0  ;;  %v971_v40 = vmax.f32 %v223_v34, 0.0  ;;  %v668_v52 = vld [vmem:[%s1065_s2 + $0x178] sm:$0xff]  ;;  %v667_v54 = vld [vmem:[%s1065_s2 + $0x170] sm:$0xff]  ;;  %v666_v55 = vld [vmem:[%s1065_s2 + $0x168] sm:$0xff] }
  0x18   : > { %774 = vmatpush3.msra.mxu1 %v252_v14  ;;  %740 = vmatprep.subr.mxu0 %v644_v15  ;;  %v665_v56 = vld [vmem:[%s1065_s2 + $0x160] sm:$0xff]  ;;  %v664_v57 = vld [vmem:[%s1065_s2 + $0x158] sm:$0xff]  ;;  %v663_v58 = vld [vmem:[%s1065_s2 + $0x150] sm:$0xff] }
  0x19   : > { %775 = vmatprep.subr.mxu1 %v251_v16  ;;  %741 = vmatpush3.msra.mxu0 %v644_v15  ;;  %v229_v45 = vrot.slane %v224_v39, 7  ;;  %v230_v46 = vrot.slane %v971_v40, 7  ;;  %v236_v49 = vrot.slane %v224_v39, 1  ;;  %v237_v50 = vrot.slane %v971_v40, 1  ;;  %v662_v59 = vld [vmem:[%s1065_s2 + $0x148] sm:$0xff]  ;;  %v661_v60 = vld [vmem:[%s1065_s2 + $0x140] sm:$0xff] }
  0x1a   : > { %776 = vmatpush3.msra.mxu1 %v251_v16  ;;  %742 = vmatprep.subr.mxu0 %v643_v18  ;;  %v660_v61 = vld [vmem:[%s1065_s2 + $0x138] sm:$0xff]  ;;  %v659_v62 = vld [vmem:[%s1065_s2 + $0x130] sm:$0xff]  ;;  %v658_v63 = vld [vmem:[%s1065_s2 + $0x128] sm:$0xff] }
  0x1b   : > { %777 = vmatprep.subr.mxu1 %v250_v21  ;;  %743 = vmatpush3.msra.mxu0 %v643_v18  ;;  %v231_v51 = vsel %vm228_vm0, %v229_v45, %v230_v46  ;;  %v238_v53 = vsel %vm235_vm1, %v236_v49, %v237_v50  ;;  %v657_v0 = vld [vmem:[%s1065_s2 + $0x120] sm:$0xff]  ;;  %v656_v1 = vld [vmem:[%s1065_s2 + $0x118] sm:$0xff]  ;;  %v655_v2 = vld [vmem:[%s1065_s2 + $0x110] sm:$0xff] }
  0x1c   : > { %778 = vmatpush3.msra.mxu1 %v250_v21  ;;  %744 = vmatprep.subr.mxu0 %v642_v24  ;;  %v654_v3 = vld [vmem:[%s1065_s2 + $0x108] sm:$0xff]  ;;  %v653_v4 = vld [vmem:[%s1065_s2 + $0x100] sm:$0xff] }
  0x1d   : > { %779 = vmatprep.subr.mxu1 %v249_v25  ;;  %745 = vmatpush3.msra.mxu0 %v642_v24 }
  0x1e   : > { %780 = vmatpush3.msra.mxu1 %v249_v25  ;;  %746 = vmatprep.subr.mxu0 %v641_v29 }
  0x1f   : > { %781 = vmatprep.subr.mxu1 %v248_v30  ;;  %747 = vmatpush3.msra.mxu0 %v641_v29 }
  0x20   : > { %782 = vmatpush3.msra.mxu1 %v248_v30  ;;  %748 = vmatprep.subr.mxu0 %v640_v31 }
  0x21   : > { %783 = vmatprep.subr.mxu1 %v247_v32  ;;  %749 = vmatpush3.msra.mxu0 %v640_v31 }
  0x22   : > { %784 = vmatpush3.msra.mxu1 %v247_v32  ;;  %750 = vmatprep.subr.mxu0 %v639_v35 }
  0x23   : > { %785 = vmatprep.subr.mxu1 %v246_v36  ;;  %751 = vmatpush3.msra.mxu0 %v639_v35 }
  0x24   : > { %786 = vmatpush3.msra.mxu1 %v246_v36  ;;  %752 = vmatprep.subr.mxu0 %v638_v37 }
  0x25   : > { %787 = vmatprep.subr.mxu1 %v245_v38  ;;  %753 = vmatpush3.msra.mxu0 %v638_v37 }
  0x26   : > { %788 = vmatpush3.msra.mxu1 %v245_v38  ;;  %754 = vmatprep.subr.mxu0 %v637_v41 }
  0x27   : > { %789 = vmatprep.subr.mxu1 %v244_v42  ;;  %755 = vmatpush3.msra.mxu0 %v637_v41 }
  0x28   : > { %790 = vmatpush3.msra.mxu1 %v244_v42  ;;  %756 = vmatprep.subr.mxu0 %v636_v43 }
  0x29   : > { %791 = vmatprep.subr.mxu1 %v243_v44  ;;  %757 = vmatpush3.msra.mxu0 %v636_v43 }
  0x2a   : > { %792 = vmatpush3.msra.mxu1 %v243_v44  ;;  %758 = vmatprep.subr.mxu0 %v635_v47 }
  0x2b   : > { %793 = vmatprep.subr.mxu1 %v242_v48  ;;  %759 = vmatpush3.msra.mxu0 %v635_v47 }
  0x2c   : > { %760 = vmatprep.mubr.f32.mxu0 %v224_v39  ;;  %794 = vmatpush3.msra.mxu1 %v242_v48 }
  0x2d   : > { %795 = vmatprep.mubr.msk.f32.mxu1 %vm651_vm2, %v229_v45  ;;  %761 = vmatmul.mubr.f32.vlgmr.msra.gmra.mxu0 %v971_v40 }
  0x2e   : > { %796 = vmatmul.mubr.f32.vlgmr.msra.gmra.mxu1 %v231_v51  ;;  %798 = vmatprep.subr.mxu0 %v668_v52 }
  0x2f   : > { %830 = vmatprep.mubr.f32.mxu0 %v238_v53  ;;  %799 = vmatpush3.msra.mxu0 %v668_v52 }
  0x30   : > { %800 = vmatprep.subr.mxu0 %v667_v54 }
  0x31   : > { %801 = vmatpush3.msra.mxu0 %v667_v54 }
  0x32   : > { %802 = vmatprep.subr.mxu0 %v666_v55 }
  0x33   : > { %803 = vmatpush3.msra.mxu0 %v666_v55 }
  0x34   : > { %804 = vmatprep.subr.mxu0 %v665_v56 }
  0x35   : > { %805 = vmatpush3.msra.mxu0 %v665_v56 }
  0x36   : > { %806 = vmatprep.subr.mxu0 %v664_v57 }
  0x37   : > { %807 = vmatpush3.msra.mxu0 %v664_v57 }
  0x38   : > { %808 = vmatprep.subr.mxu0 %v663_v58 }
  0x39   : > { %809 = vmatpush3.msra.mxu0 %v663_v58 }
  0x3a   : > { %810 = vmatprep.subr.mxu0 %v662_v59 }
  0x3b   : > { %811 = vmatpush3.msra.mxu0 %v662_v59 }
  0x3c   : > { %812 = vmatprep.subr.mxu0 %v661_v60 }
  0x3d   : > { %813 = vmatpush3.msra.mxu0 %v661_v60 }
  0x3e   : > { %814 = vmatprep.subr.mxu0 %v660_v61 }
  0x3f   : > { %815 = vmatpush3.msra.mxu0 %v660_v61 }
  0x40   : > { %816 = vmatprep.subr.mxu0 %v659_v62 }
  0x41   : > { %817 = vmatpush3.msra.mxu0 %v659_v62 }
  0x42   : > { %818 = vmatprep.subr.mxu0 %v658_v63 }
  0x43   : > { %819 = vmatpush3.msra.mxu0 %v658_v63 }
  0x44   : > { %820 = vmatprep.subr.mxu0 %v657_v0 }
  0x45   : > { %821 = vmatpush3.msra.mxu0 %v657_v0 }
  0x46   : > { %822 = vmatprep.subr.mxu0 %v656_v1 }
  0x47   : > { %823 = vmatpush3.msra.mxu0 %v656_v1 }
  0x48   : > { %824 = vmatprep.subr.mxu0 %v655_v2 }
  0x49   : > { %825 = vmatpush3.msra.mxu0 %v655_v2 }
  0x4a   : > { %826 = vmatprep.subr.mxu0 %v654_v3 }
  0x4b   : > { %827 = vmatpush3.msra.mxu0 %v654_v3 }
  0x4c   : > { %828 = vmatprep.subr.mxu0 %v653_v4 }
  0x4d   : > { %829 = vmatpush3.msra.mxu0 %v653_v4 }
  0x4e   : > { %831 = vmatmul.mubr.msk.f32.vlgmr.msra.gmra.mxu0 %vm235_vm1, %v237_v50 }
  0xed   : > { %v762_v5 = vpop.f32.mrf.mxu0 }
  0xee   : > { %v797_v6 = vpop.f32.mrf.mxu1 }
  0xef   : > { %v341_v7 = vpop.f32.mrf.mxu0  ;;  %v422_v9 = vadd.f32 %v797_v6, %v762_v5 }
  0xf0   : > { %v416_v8 = vpop.f32.mrf.mxu1 }
  0xf1   : > { %v417_v11 = vadd.f32 %v416_v8, %v341_v7 }
 0x10e   : > { %v832_v10 = vpop.f32.mrf.mxu0 }
 0x10f   : > { %v518_v12 = vadd.f32 %v832_v10, %v422_v9 }
 0x110   : > { %v508_v13 = vpop.f32.mrf.mxu0 }
 0x111   : > { %520 = vst [vmem:[%s204_s28 + $0x8] sm:$0xff] %v518_v12  ;;  %v517_v14 = vadd.f32 %v508_v13, %v417_v11  ;;  %v529_v15 = vmul.f32 %v518_v12, %v518_v12 }
 0x113   : > { %519 = vst [vmem:[%s204_s28] sm:$0xff] %v517_v14  ;;  %v521_v16 = vadd.f32 %v518_v12, %v517_v14  ;;  %v528_v17 = vmul.f32 %v517_v14, %v517_v14 }
 0x115   : > { %v522_v18 = vrot.slane %v521_v16, 4  ;;  %v530_v19 = vadd.f32 %v529_v15, %v528_v17 }
 0x117   : > { %v523_v20 = vadd.f32 %v522_v18, %v521_v16  ;;  %v531_v21 = vrot.slane %v530_v19, 4 }
 0x119   : > { %v524_v22 = vrot.slane %v523_v20, 2  ;;  %v532_v23 = vadd.f32 %v531_v21, %v530_v19 }
 0x11b   : > { %v525_v24 = vadd.f32 %v524_v22, %v523_v20  ;;  %v533_v25 = vrot.slane %v532_v23, 2 }
 0x11d   : > { %v526_v26 = vrot.slane %v525_v24, 1  ;;  %v534_v27 = vadd.f32 %v533_v25, %v532_v23 }
 0x11f   : > { %v535_v28 = vrot.slane %v534_v27, 1  ;;  %v527_v29 = vadd.f32 %v526_v26, %v525_v24 }
 0x121   : > { %v536_v30 = vadd.f32 %v535_v28, %v534_v27 }
 0x123   : > { %v537_v31 = vsel %vm228_vm0, %v527_v29, %v536_v30 }
 0x124   : > { %538 = vst [vmem:[%s208_s5] sm:$0x3] %v537_v31 }
 0x125 PF: > { %s15_s15 = sadd.s32 1, %s847_s15  }
 0x126   : > { %p12_p4 = scmp.ge.s32.totalorder %s15_s15, 4  }
 0x128   :  { %14 = sbr.rel (!%p12_p4) target bundleno = 1 (0x1), region = 76 }

// kernel: residual_block_forward.5
= control target key start
LH: loop header
LB: loop body
LE: loop exit
PB: predicated region body
PF: predicated region fallthrough
CT: control target
= control target key end

     0   :  { %s333_s12 = smov 0   ;;  %s356_s0 = inlined_call_operand.vmem [shape: f32[2,16,128], index: 0, kind: input, shape index: {}]   ;;  %s357_s1 = inlined_call_operand.vmem [shape: f32[2,16,128], index: 1, kind: input, shape index: {}]   ;;  %s358_s2 = inlined_call_operand.vmem [shape: f32[2,128], index: 2, kind: input, shape index: {}]   ;;  %s359_s3 = inlined_call_operand.vmem [shape: f32[2,16,128], index: 3, kind: output, shape index: {}]  }
   0x1 LB: > { %s281_s13 = sadd.s32 4294967295, %s311_s12   ;;  %p285_p0 = scmp.ge.s32.totalorder %s311_s12, 1  ;;  %s311_s12 = sphi %s333_s12, %s13_s12  }
   0x2   : > { %p147_p1 = scmp.lt.s32.totalorder %s311_s12, 3 }
   0x4   : > { %p148_p2 = pnand %p285_p0, %p147_p1 }
   0x5   : > { %p176_p3 = scmp.lt.s32.totalorder (!%p148_p2), %s281_s13, 1 }
   0x6   : > { %151 = sbr.rel (%p148_p2) target bundleno = 28 (0x1c), region = 32 }
   0xb   : > { %v194_v0 = vlaneseq  ;;  %s361_s13 = smov (!%p176_p3, %s281_s13), 1  ;;  %v191_v2 = vld [vmem:[%s358_s2] sm:$0x3] }
   0xc   : > { %s294_s16 = sshll.u32 %s361_s13, 4 }
   0xd   : > { %v195_v1 = vshrl.u32 %v194_v0, 7  ;;  %s180_s19 = scalar_lea.vmem %s356_s0, %s294_s16  ;;  %s185_s22 = scalar_lea.vmem %s357_s1, %s294_s16 }
   0xe   : > { %v192_v5 = vld [vmem:[%s180_s19] sm:$0xff]  ;;  %v193_v6 = vld [vmem:[%s180_s19 + $0x8] sm:$0xff]  ;;  %s190_s25 = scalar_lea.vmem %s359_s3, %s294_s16 }
   0xf   : > { %v196_v3 = vsub.s32 0, %v195_v1  ;;  %v202_v4 = vsub.s32 1, %v195_v1  ;;  %v206_v11 = vld [vmem:[%s185_s22] sm:$0xff]  ;;  %v207_v12 = vld [vmem:[%s185_s22 + $0x8] sm:$0xff] }
  0x11   : > { %v197_v7 = vrot.slane %v191_v2, %v196_v3  ;;  %v203_v8 = vrot.slane %v191_v2, %v202_v4 }
  0x13   : > { %v198_v9 = vmul.f32 %v197_v7, %v192_v5  ;;  %v199_v10 = vmul.f32 %v197_v7, %v193_v6 }
  0x15   : > { %v204_v13 = vadd.f32 %v203_v8, %v198_v9  ;;  %v205_v14 = vadd.f32 %v203_v8, %v199_v10 }
  0x17   : > { %v208_v15 = vadd.f32 %v206_v11, %v204_v13  ;;  %v209_v16 = vadd.f32 %v207_v12, %v205_v14 }
  0x19   : > { %v210_v17 = vmax.f32 %v208_v15, 0.0  ;;  %v211_v18 = vmax.f32 %v209_v16, 0.0 }
  0x1b   : > { %212 = vst [vmem:[%s190_s25] sm:$0xff] %v210_v17  ;;  %213 = vst [vmem:[%s190_s25 + $0x8] sm:$0xff] %v211_v18 }
  0x1c PF: > { %s13_s12 = sadd.s32 1, %s311_s12  }
  0x1d   : > { %p10_p4 = scmp.ge.s32.totalorder %s13_s12, 4  }
  0x1f   :  { %12 = sbr.rel (!%p10_p4) target bundleno = 1 (0x1), region = 65 }

</bundles_post_ra>
